<compile_context>
chip_gen: v7x
topology: tpu7x:2x2x1
jax: 0.10.0
libtpu: 0.0.40
codegen_flags: <defaults>
</compile_context>

<pallas_src>
import numpy as np
import jax
import jax.numpy as jnp
from jax.experimental import pallas as pl
from jax.experimental.pallas import tpu as pltpu


# ------------------------------ static geometry ------------------------------
H, W = 16, 8                       # input spatial size implied by fc.in_features==96
K1, S1, C1 = 4, 2, 16              # conv1
K2, S2, C2 = 3, 2, 32              # conv2
OH1, OW1 = (H - K1) // S1 + 1, (W - K1) // S1 + 1      # 7, 3
OH2, OW2 = (OH1 - K2) // S2 + 1, (OW1 - K2) // S2 + 1  # 3, 1
P1, P2 = OH1 * OW1, OH2 * OW2      # 21, 3
NPIX = H * W                       # 128  (one full lane row per image)
F1 = P1 * C1                       # 336  conv1 feature width (pos-major, ch-minor)
F2 = P2 * C2                       # 96   conv2 feature width (pos-major, ch-minor)
NOUT = 3

MAX_TILE = 1024                    # batch-tile cap (rows per grid step)


def _round_up(x, m):
    return ((x + m - 1) // m) * m


# ------------------------------- Pallas kernel --------------------------------
def _dqn_fused_kernel(x_ref, w1_ref, b1_ref, w2_ref, b2_ref, wf_ref, bf_ref, o_ref):
    # conv1 + ReLU  (im2col selection baked into w1:  [TB,128] @ [128,336])
    h1 = jnp.dot(x_ref[...], w1_ref[...], preferred_element_type=jnp.float32)
    h1 = jnp.maximum(h1 + b1_ref[...], 0.0)
    # conv2 + ReLU  ([TB,336] @ [336,96]; receptive field baked into w2)
    h2 = jnp.dot(h1, w2_ref[...], preferred_element_type=jnp.float32)
    h2 = jnp.maximum(h2 + b2_ref[...], 0.0)
    # fc + softmax(dim=1)  ([TB,96] @ [96,3]); exact normalization in f32
    z = jnp.dot(h2, wf_ref[...], preferred_element_type=jnp.float32) + bf_ref[...]
    z = z - jnp.max(z, axis=-1, keepdims=True)
    e = jnp.exp(z)
    o_ref[...] = e * pl.reciprocal(jnp.sum(e, axis=-1, keepdims=True), approx=False)


# ------------------------------ parameter setup -------------------------------
def init_params(key):
    """PyTorch-style init: U(-1/sqrt(fan_in), +1/sqrt(fan_in)), PyTorch layouts."""
    ks = jax.random.split(key, 6)

    def u(k, shape, fan_in):
        bound = 1.0 / (fan_in ** 0.5)
        return jax.random.uniform(k, shape, jnp.float32, -bound, bound)

    return dict(
        w1=u(ks[0], (C1, 1, K1, K1), 1 * K1 * K1),
        b1=u(ks[1], (C1,), 1 * K1 * K1),
        w2=u(ks[2], (C2, C1, K2, K2), C1 * K2 * K2),
        b2=u(ks[3], (C2,), C1 * K2 * K2),
        wf=u(ks[4], (NOUT, F2), F2),
        bf=u(ks[5], (NOUT,), F2),
    )


def prepare_params(params):
    """One-time layout bake: convs -> dense matmul weights with im2col selection
    folded in; fc rows permuted to undo the NHWC-vs-NCHW flatten difference."""
    w1, b1 = params["w1"], params["b1"]
    w2, b2 = params["w2"], params["b2"]
    wf, bf = params["wf"], params["bf"]

    # conv1: selection tensor  e1[pixel, patch, patch-element]
    e1 = np.zeros((NPIX, P1, K1 * K1), np.float32)
    for oh in range(OH1):
        for ow in range(OW1):
            p = oh * OW1 + ow
            for kh in range(K1):
                for kw in range(K1):
                    q = (oh * S1 + kh) * W + (ow * S1 + kw)
                    e1[q, p, kh * K1 + kw] = 1.0
    w1r = w1.reshape(C1, K1 * K1)                            # [c, kh*K1+kw]  (Cin=1)
    w1_big = jnp.einsum("qpe,ce->qpc", jnp.asarray(e1), w1r).reshape(NPIX, F1)
    b1_big = jnp.tile(b1, (P1,)).reshape(1, F1)

    # conv2: selection tensor  e2[conv1-pos, conv2-pos, kh, kw]
    e2 = np.zeros((P1, P2, K2, K2), np.float32)
    for oh in range(OH2):
        for ow in range(OW2):
            p2 = oh * OW2 + ow
            for kh in range(K2):
                for kw in range(K2):
                    p1 = (oh * S2 + kh) * OW1 + (ow * S2 + kw)
                    e2[p1, p2, kh, kw] = 1.0
    # rows indexed (p1, c1), cols (p2, c2) -- matches h1/h2 kernel layouts
    w2_big = jnp.einsum("pqkl,dckl->pcqd", jnp.asarray(e2), w2).reshape(F1, P2 * C2)
    b2_big = jnp.tile(b2, (P2,)).reshape(1, P2 * C2)

    # fc: PyTorch flattens NCHW -> index c2*P2 + p2; our h2 layout is p2*C2 + c2.
    wf_perm = jnp.transpose(wf.reshape(NOUT, C2, P2), (2, 1, 0)).reshape(F2, NOUT)

    return dict(w1=w1_big, b1=b1_big, w2=w2_big, b2=b2_big,
                wf=wf_perm, bf=bf.reshape(1, NOUT))


# --------------------------------- forward ------------------------------------
def dqn_forward(prep, x):
    """x: [B, 1, 16, 8] float32 (NCHW, as PyTorch). Returns [B, 3] softmax probs."""
    B = x.shape[0]
    xf = x.reshape(B, NPIX).astype(jnp.float32)              # one lane row / image

    # Batch tile: multiple of 8 sublanes, capped so per-step VMEM stays small.
    TB = min(MAX_TILE, _round_up(B, 8))
    Bp = _round_up(B, TB)
    if Bp != B:
        xf = jnp.pad(xf, ((0, Bp - B), (0, 0)))

    out = pl.pallas_call(
        _dqn_fused_kernel,
        out_shape=jax.ShapeDtypeStruct((Bp, NOUT), jnp.float32),
        grid_spec=pltpu.PrefetchScalarGridSpec(
            num_scalar_prefetch=0,
            grid=(Bp // TB,),
            in_specs=[
                pl.BlockSpec((TB, NPIX), lambda i: (i, 0)),    # x tile
                pl.BlockSpec((NPIX, F1), lambda i: (0, 0)),    # conv1 weight (dense)
                pl.BlockSpec((1, F1),    lambda i: (0, 0)),    # conv1 bias
                pl.BlockSpec((F1, F2),   lambda i: (0, 0)),    # conv2 weight (dense)
                pl.BlockSpec((1, F2),    lambda i: (0, 0)),    # conv2 bias
                pl.BlockSpec((F2, NOUT), lambda i: (0, 0)),    # fc weight (permuted)
                pl.BlockSpec((1, NOUT),  lambda i: (0, 0)),    # fc bias
            ],
            out_specs=pl.BlockSpec((TB, NOUT), lambda i: (i, 0)),
        ),
        compiler_params=pltpu.CompilerParams(
            dimension_semantics=("parallel",),
        ),
    )(xf, prep["w1"], prep["b1"], prep["w2"], prep["b2"], prep["wf"], prep["bf"])
    return out[:B]


# ------------------------- pure-XLA reference (check) --------------------------
def _reference_forward(params, x):
    h1 = jax.lax.conv_general_dilated(
        x, params["w1"], window_strides=(S1, S1), padding="VALID",
        dimension_numbers=("NCHW", "OIHW", "NCHW"))
    h1 = jax.nn.relu(h1 + params["b1"].reshape(1, C1, 1, 1))
    h2 = jax.lax.conv_general_dilated(
        h1, params["w2"], window_strides=(S2, S2), padding="VALID",
        dimension_numbers=("NCHW", "OIHW", "NCHW"))
    h2 = jax.nn.relu(h2 + params["b2"].reshape(1, C2, 1, 1))
    feat = h2.reshape(x.shape[0], -1)                         # NCHW flatten, as torch
    z = feat @ params["wf"].T + params["bf"]
    return jax.nn.softmax(z, axis=-1)


if __name__ == "__main__":
    key = jax.random.PRNGKey(0)
    pkey, xkey = jax.random.split(key)

    raw_params = init_params(pkey)
    prep_params = prepare_params(raw_params)                  # one-time layout bake

    B = 2
    x = jax.random.uniform(xkey, (B, 1, H, W), jnp.float32)

    out = jax.jit(dqn_forward)(prep_params, x)
    out = jax.block_until_ready(out)

    ref = _reference_forward(raw_params, x)

    assert out.shape == (B, NOUT)
    assert bool(jnp.all(jnp.isfinite(out)))
    assert bool(jnp.allclose(jnp.sum(out, axis=-1), 1.0, atol=1e-5))
    # loose tolerance: allows matmul-precision differences, catches layout bugs
    assert bool(jnp.allclose(out, ref, rtol=2e-2, atol=2e-3))
    print("KERNEL_OK")
</pallas_src>

<mosaic_0001>
module attributes {stable_mosaic.version = 11 : i64} {
  func.func @_dqn_fused_kernel(%arg0: i32, %arg1: memref<8x128xf32, #tpu.memory_space<vmem>>, %arg2: memref<128x336xf32, #tpu.memory_space<vmem>>, %arg3: memref<1x336xf32, #tpu.memory_space<vmem>>, %arg4: memref<336x96xf32, #tpu.memory_space<vmem>>, %arg5: memref<1x96xf32, #tpu.memory_space<vmem>>, %arg6: memref<96x3xf32, #tpu.memory_space<vmem>>, %arg7: memref<1x3xf32, #tpu.memory_space<vmem>>, %arg8: memref<8x3xf32, #tpu.memory_space<vmem>>) attributes {dimension_semantics = [#tpu.dimension_semantics<parallel>], iteration_bounds = array<i64: 1>, scalar_prefetch = 0 : i64, scratch_operands = 0 : i64, tpu.core_type = #tpu.core_type<tc>, window_params = [{transform_indices = @transform_0, window_bounds = array<i64: 8, 128>}, {pipeline_mode = #tpu.pipeline_mode<synchronous>, transform_indices = @transform_1, window_bounds = array<i64: 128, 336>}, {pipeline_mode = #tpu.pipeline_mode<synchronous>, transform_indices = @transform_2, window_bounds = array<i64: 1, 336>}, {pipeline_mode = #tpu.pipeline_mode<synchronous>, transform_indices = @transform_3, window_bounds = array<i64: 336, 96>}, {pipeline_mode = #tpu.pipeline_mode<synchronous>, transform_indices = @transform_4, window_bounds = array<i64: 1, 96>}, {pipeline_mode = #tpu.pipeline_mode<synchronous>, transform_indices = @transform_5, window_bounds = array<i64: 96, 3>}, {pipeline_mode = #tpu.pipeline_mode<synchronous>, transform_indices = @transform_6, window_bounds = array<i64: 1, 3>}, {transform_indices = @transform_7, window_bounds = array<i64: 8, 3>}]} {
    %c0 = arith.constant 0 : index
    %c0_0 = arith.constant 0 : index
    %0 = vector.load %arg1[%c0, %c0_0] : memref<8x128xf32, #tpu.memory_space<vmem>>, vector<8x128xf32>
    %c0_1 = arith.constant 0 : index
    %c0_2 = arith.constant 0 : index
    %1 = vector.load %arg2[%c0_1, %c0_2] : memref<128x336xf32, #tpu.memory_space<vmem>>, vector<128x336xf32>
    %cst = arith.constant dense<0.000000e+00> : vector<8x336xf32>
    %2 = tpu.matmul %0, %1, %cst {dimension_numbers = #tpu.dot_dimension_numbers<[1], [0], [0], [1], [0, 0, 1, 1], [], []>} : vector<8x128xf32>, vector<128x336xf32>, vector<8x336xf32> -> vector<8x336xf32>
    %c0_3 = arith.constant 0 : index
    %c0_4 = arith.constant 0 : index
    %3 = vector.load %arg3[%c0_3, %c0_4] : memref<1x336xf32, #tpu.memory_space<vmem>>, vector<1x336xf32>
    %4 = vector.broadcast %3 : vector<1x336xf32> to vector<8x336xf32>
    %5 = arith.addf %2, %4 : vector<8x336xf32>
    %cst_5 = arith.constant 0.000000e+00 : f32
    %6 = vector.broadcast %cst_5 : f32 to vector<8x336xf32>
    %7 = arith.maximumf %5, %6 : vector<8x336xf32>
    %c0_6 = arith.constant 0 : index
    %c0_7 = arith.constant 0 : index
    %8 = vector.load %arg4[%c0_6, %c0_7] : memref<336x96xf32, #tpu.memory_space<vmem>>, vector<336x96xf32>
    %cst_8 = arith.constant dense<0.000000e+00> : vector<8x96xf32>
    %9 = tpu.matmul %7, %8, %cst_8 {dimension_numbers = #tpu.dot_dimension_numbers<[1], [0], [0], [1], [0, 0, 1, 1], [], []>} : vector<8x336xf32>, vector<336x96xf32>, vector<8x96xf32> -> vector<8x96xf32>
    %c0_9 = arith.constant 0 : index
    %c0_10 = arith.constant 0 : index
    %10 = vector.load %arg5[%c0_9, %c0_10] : memref<1x96xf32, #tpu.memory_space<vmem>>, vector<1x96xf32>
    %11 = vector.broadcast %10 : vector<1x96xf32> to vector<8x96xf32>
    %12 = arith.addf %9, %11 : vector<8x96xf32>
    %cst_11 = arith.constant 0.000000e+00 : f32
    %13 = vector.broadcast %cst_11 : f32 to vector<8x96xf32>
    %14 = arith.maximumf %12, %13 : vector<8x96xf32>
    %c0_12 = arith.constant 0 : index
    %c0_13 = arith.constant 0 : index
    %15 = vector.load %arg6[%c0_12, %c0_13] : memref<96x3xf32, #tpu.memory_space<vmem>>, vector<96x3xf32>
    %cst_14 = arith.constant dense<0.000000e+00> : vector<8x3xf32>
    %16 = tpu.matmul %14, %15, %cst_14 {dimension_numbers = #tpu.dot_dimension_numbers<[1], [0], [0], [1], [0, 0, 1, 1], [], []>} : vector<8x96xf32>, vector<96x3xf32>, vector<8x3xf32> -> vector<8x3xf32>
    %c0_15 = arith.constant 0 : index
    %c0_16 = arith.constant 0 : index
    %17 = vector.load %arg7[%c0_15, %c0_16] : memref<1x3xf32, #tpu.memory_space<vmem>>, vector<1x3xf32>
    %18 = vector.broadcast %17 : vector<1x3xf32> to vector<8x3xf32>
    %19 = arith.addf %16, %18 : vector<8x3xf32>
    %cst_17 = arith.constant dense<0xFF800000> : vector<8xf32>
    %20 = vector.multi_reduction <maximumf>, %19, %cst_17 [1] : vector<8x3xf32> to vector<8xf32>
    %21 = vector.shape_cast %20 : vector<8xf32> to vector<8x1xf32>
    %22 = vector.broadcast %21 : vector<8x1xf32> to vector<8x3xf32>
    %23 = arith.subf %19, %22 : vector<8x3xf32>
    %24 = math.exp %23 : vector<8x3xf32>
    %cst_18 = arith.constant dense<0.000000e+00> : vector<8xf32>
    %25 = vector.multi_reduction <add>, %24, %cst_18 [1] : vector<8x3xf32> to vector<8xf32>
    %26 = vector.shape_cast %25 : vector<8xf32> to vector<8x1xf32>
    %27 = tpu.reciprocal %26 : vector<8x1xf32> -> vector<8x1xf32>
    %28 = vector.broadcast %27 : vector<8x1xf32> to vector<8x3xf32>
    %29 = arith.mulf %24, %28 : vector<8x3xf32>
    %c0_19 = arith.constant 0 : index
    %c0_20 = arith.constant 0 : index
    %30 = vector.load %arg8[%c0_19, %c0_20] : memref<8x3xf32, #tpu.memory_space<vmem>>, vector<8x3xf32>
    tpu.vector_store %arg8[%c0_19, %c0_20], %29 {strides = array<i32>} : memref<8x3xf32, #tpu.memory_space<vmem>>, vector<8x3xf32>,
    return
  }
  func.func @transform_0(%arg0: i32) -> (i32, i32) {
    %c0_i32 = arith.constant 0 : i32
    %c0_i32_0 = arith.constant 0 : i32
    return %arg0, %c0_i32 : i32, i32
  }
  func.func @transform_1(%arg0: i32) -> (i32, i32) {
    %c0_i32 = arith.constant 0 : i32
    %c0_i32_0 = arith.constant 0 : i32
    %c0_i32_1 = arith.constant 0 : i32
    return %c0_i32, %c0_i32_0 : i32, i32
  }
  func.func @transform_2(%arg0: i32) -> (i32, i32) {
    %c0_i32 = arith.constant 0 : i32
    %c0_i32_0 = arith.constant 0 : i32
    %c0_i32_1 = arith.constant 0 : i32
    return %c0_i32, %c0_i32_0 : i32, i32
  }
  func.func @transform_3(%arg0: i32) -> (i32, i32) {
    %c0_i32 = arith.constant 0 : i32
    %c0_i32_0 = arith.constant 0 : i32
    %c0_i32_1 = arith.constant 0 : i32
    return %c0_i32, %c0_i32_0 : i32, i32
  }
  func.func @transform_4(%arg0: i32) -> (i32, i32) {
    %c0_i32 = arith.constant 0 : i32
    %c0_i32_0 = arith.constant 0 : i32
    %c0_i32_1 = arith.constant 0 : i32
    return %c0_i32, %c0_i32_0 : i32, i32
  }
  func.func @transform_5(%arg0: i32) -> (i32, i32) {
    %c0_i32 = arith.constant 0 : i32
    %c0_i32_0 = arith.constant 0 : i32
    %c0_i32_1 = arith.constant 0 : i32
    return %c0_i32, %c0_i32_0 : i32, i32
  }
  func.func @transform_6(%arg0: i32) -> (i32, i32) {
    %c0_i32 = arith.constant 0 : i32
    %c0_i32_0 = arith.constant 0 : i32
    %c0_i32_1 = arith.constant 0 : i32
    return %c0_i32, %c0_i32_0 : i32, i32
  }
  func.func @transform_7(%arg0: i32) -> (i32, i32) {
    %c0_i32 = arith.constant 0 : i32
    %c0_i32_0 = arith.constant 0 : i32
    return %arg0, %c0_i32 : i32, i32
  }
}

</mosaic_0001>

<bundles_post_ra>
// kernel: dqn_forward.1
= control target key start
LH: loop header
LB: loop body
LE: loop exit
PB: predicated region body
PF: predicated region fallthrough
CT: control target
= control target key end

     0   :  { %v833_v3 = vmov 0.0|0.0   ;;  %v834_v4 = vmov 0.0   ;;  %vm835_vm0 = vmmov 0   ;;  %vm285_vm1 = vcmask 654336   ;;  %s1226_s1 = inlined_call_operand.vmem [shape: f32[128,336], index: 1, kind: input, shape index: {}]   ;;  %s1227_s3 = inlined_call_operand.vmem [shape: f32[336,96], index: 3, kind: input, shape index: {}]   ;;  %s1228_s0 = inlined_call_operand.vmem [shape: f32[8,128], index: 0, kind: input, shape index: {}]   ;;  %s1229_s2 = inlined_call_operand.vmem [shape: f32[1,336], index: 2, kind: input, shape index: {}]   ;;  %s1230_s5 = inlined_call_operand.vmem [shape: f32[96,3], index: 5, kind: input, shape index: {}]   ;;  %s1231_s4 = inlined_call_operand.vmem [shape: f32[1,96], index: 4, kind: input, shape index: {}]   ;;  %s1232_s6 = inlined_call_operand.vmem [shape: f32[1,3], index: 6, kind: input, shape index: {}]   ;;  %s1233_s7 = inlined_call_operand.vmem [shape: f32[8,3], index: 7, kind: output, shape index: {}]  }
   0x1   :  { %v28_v0 = vld [vmem:[%s1226_s1 + $0x8] sm:$0xff]  ;;  %v31_v1 = vld [vmem:[%s1226_s1 + $0x20] sm:$0xff]  ;;  %737 = vmatprep.subr.bf16.mxu1 %v833_v3  ;;  %156 = vmatprep.mubr.f32.mxu0 %v834_v4  ;;  %v30_v6 = vld [vmem:[%s1226_s1 + $0x18] sm:$0xff]  ;;  %vm449_vm2 = vcmask 785408   ;;  %vm523_vm3 = vcmask 23552  }
   0x2   :  { %v27_v2 = vld [vmem:[%s1226_s1] sm:$0xff]  ;;  %v705_v5 = vpack.c.bf16 %v31_v1, %v28_v0  ;;  %v34_v7 = vld [vmem:[%s1226_s1 + $0x38] sm:$0xff]  ;;  %v37_v8 = vld [vmem:[%s1226_s1 + $0x50] sm:$0xff]  ;;  %652 = vmatprep.mubr.msk.f32.mxu1 %vm835_vm0, %v834_v4 }
   0x3   :  { %v707_v9 = vpack.c.bf16 %v30_v6, %v27_v2  ;;  %v709_v10 = vpack.c.bf16 %v37_v8, %v34_v7  ;;  %v33_v11 = vld [vmem:[%s1226_s1 + $0x30] sm:$0xff]  ;;  %v36_v12 = vld [vmem:[%s1226_s1 + $0x48] sm:$0xff]  ;;  %v43_v16 = vld [vmem:[%s1226_s1 + $0x80] sm:$0xff] }
   0x4   :  { %v29_v13 = vld [vmem:[%s1226_s1 + $0x10] sm:$0xff]  ;;  %706 = vmatprep.subr.bf16.mxu0 %v705_v5  ;;  %v32_v14 = vld [vmem:[%s1226_s1 + $0x28] sm:$0xff]  ;;  %v711_v17 = vpack.c.bf16 %v36_v12, %v33_v11  ;;  %v35_v19 = vld [vmem:[%s1226_s1 + $0x40] sm:$0xff] }
   0x5   :  { %v40_v15 = vld [vmem:[%s1226_s1 + $0x68] sm:$0xff]  ;;  %708 = vmatpush1.bf16.msra.mxu0 %v707_v9  ;;  %v738_v18 = vpack.c.bf16 %v32_v14, %v29_v13  ;;  %v39_v21 = vld [vmem:[%s1226_s1 + $0x60] sm:$0xff]  ;;  %v42_v22 = vld [vmem:[%s1226_s1 + $0x78] sm:$0xff] }
   0x6   :  { %710 = vmatprep.subr.bf16.mxu0 %v709_v10  ;;  %v713_v20 = vpack.c.bf16 %v43_v16, %v40_v15  ;;  %v38_v23 = vld [vmem:[%s1226_s1 + $0x58] sm:$0xff]  ;;  %v49_v26 = vld [vmem:[%s1226_s1 + $0xb0] sm:$0xff]  ;;  %v44_v28 = vld [vmem:[%s1226_s1 + $0x88] sm:$0xff]  ;;  %v715_v29 = vpack.c.bf16 %v42_v22, %v39_v21 }
   0x7   :  { %739 = vmatpush3.bf16.msra.mxu1 %v738_v18  ;;  %v741_v24 = vpack.c.bf16 %v38_v23, %v35_v19  ;;  %v46_v25 = vld [vmem:[%s1226_s1 + $0x98] sm:$0xff]  ;;  %v41_v27 = vld [vmem:[%s1226_s1 + $0x70] sm:$0xff]  ;;  %v48_v32 = vld [vmem:[%s1226_s1 + $0xa8] sm:$0xff] }
   0x8   :  { %740 = vmatprep.subr.bf16.mxu1 %v833_v3  ;;  %v717_v30 = vpack.c.bf16 %v49_v26, %v46_v25  ;;  %v45_v31 = vld [vmem:[%s1226_s1 + $0x90] sm:$0xff]  ;;  %v744_v33 = vpack.c.bf16 %v44_v28, %v41_v27  ;;  %v52_v34 = vld [vmem:[%s1226_s1 + $0xc8] sm:$0xff]  ;;  %v55_v35 = vld [vmem:[%s1226_s1 + $0xe0] sm:$0xff] }
   0x9   :  { %712 = vmatpush1.bf16.msra.mxu0 %v711_v17  ;;  %v47_v36 = vld [vmem:[%s1226_s1 + $0xa0] sm:$0xff]  ;;  %v50_v37 = vld [vmem:[%s1226_s1 + $0xb8] sm:$0xff]  ;;  %v719_v38 = vpack.c.bf16 %v48_v32, %v45_v31  ;;  %v721_v39 = vpack.c.bf16 %v55_v35, %v52_v34  ;;  %v61_v44 = vld [vmem:[%s1226_s1 + $0x110] sm:$0xff] }
   0xa   :  { %714 = vmatprep.subr.bf16.mxu0 %v713_v20  ;;  %v51_v40 = vld [vmem:[%s1226_s1 + $0xc0] sm:$0xff]  ;;  %v54_v41 = vld [vmem:[%s1226_s1 + $0xd8] sm:$0xff]  ;;  %v747_v42 = vpack.c.bf16 %v50_v37, %v47_v36  ;;  %v53_v45 = vld [vmem:[%s1226_s1 + $0xd0] sm:$0xff] }
   0xb   :  { %742 = vmatpush3.bf16.msra.mxu1 %v741_v24  ;;  %v58_v43 = vld [vmem:[%s1226_s1 + $0xf8] sm:$0xff]  ;;  %v56_v46 = vld [vmem:[%s1226_s1 + $0xe8] sm:$0xff]  ;;  %v723_v47 = vpack.c.bf16 %v54_v41, %v51_v40  ;;  %v57_v49 = vld [vmem:[%s1226_s1 + $0xf0] sm:$0xff] }
   0xc   :  { %743 = vmatprep.subr.bf16.mxu1 %v833_v3  ;;  %v725_v48 = vpack.c.bf16 %v61_v44, %v58_v43  ;;  %v60_v50 = vld [vmem:[%s1226_s1 + $0x108] sm:$0xff]  ;;  %v750_v51 = vpack.c.bf16 %v56_v46, %v53_v45  ;;  %v67_v53 = vld [vmem:[%s1226_s1 + $0x140] sm:$0xff]  ;;  %v62_v55 = vld [vmem:[%s1226_s1 + $0x118] sm:$0xff] }
   0xd   :  { %716 = vmatpush1.bf16.msra.mxu0 %v715_v29  ;;  %v64_v52 = vld [vmem:[%s1226_s1 + $0x128] sm:$0xff]  ;;  %v59_v54 = vld [vmem:[%s1226_s1 + $0x100] sm:$0xff]  ;;  %v727_v56 = vpack.c.bf16 %v60_v50, %v57_v49  ;;  %v66_v59 = vld [vmem:[%s1226_s1 + $0x138] sm:$0xff] }
   0xe   :  { %718 = vmatprep.subr.bf16.mxu0 %v717_v30  ;;  %v729_v57 = vpack.c.bf16 %v67_v53, %v64_v52  ;;  %v63_v58 = vld [vmem:[%s1226_s1 + $0x120] sm:$0xff]  ;;  %v753_v60 = vpack.c.bf16 %v62_v55, %v59_v54  ;;  %v70_v61 = vld [vmem:[%s1226_s1 + $0x158] sm:$0xff]  ;;  %v73_v62 = vld [vmem:[%s1226_s1 + $0x170] sm:$0xff] }
   0xf   :  { %745 = vmatpush3.bf16.msra.mxu1 %v744_v33  ;;  %v65_v63 = vld [vmem:[%s1226_s1 + $0x130] sm:$0xff]  ;;  %v68_v0 = vld [vmem:[%s1226_s1 + $0x148] sm:$0xff]  ;;  %v731_v1 = vpack.c.bf16 %v66_v59, %v63_v58  ;;  %v733_v2 = vpack.c.bf16 %v73_v62, %v70_v61  ;;  %v252_v8 = vld [vmem:[%s1227_s3 + $0x80] sm:$0xff] }
  0x10   :  { %746 = vmatprep.subr.bf16.mxu1 %v833_v3  ;;  %v69_v5 = vld [vmem:[%s1226_s1 + $0x150] sm:$0xff]  ;;  %v72_v6 = vld [vmem:[%s1226_s1 + $0x168] sm:$0xff]  ;;  %v756_v7 = vpack.c.bf16 %v68_v0, %v65_v63  ;;  %v71_v10 = vld [vmem:[%s1226_s1 + $0x160] sm:$0xff] }
  0x11   :  { %720 = vmatpush1.bf16.msra.mxu0 %v719_v38  ;;  %v253_v9 = vld [vmem:[%s1227_s3 + $0x88] sm:$0xff]  ;;  %v74_v11 = vld [vmem:[%s1226_s1 + $0x178] sm:$0xff]  ;;  %v735_v12 = vpack.c.bf16 %v72_v6, %v69_v5  ;;  %v236_v14 = vld [vmem:[%s1227_s3] sm:$0xff] }
  0x12   :  { %722 = vmatprep.subr.bf16.mxu0 %v721_v39  ;;  %v761_v13 = vpack.c.bf16 %v253_v9, %v252_v8  ;;  %v237_v15 = vld [vmem:[%s1227_s3 + $0x8] sm:$0xff]  ;;  %v759_v16 = vpack.c.bf16 %v74_v11, %v71_v10  ;;  %v254_v17 = vld [vmem:[%s1227_s3 + $0x90] sm:$0xff]  ;;  %v255_v18 = vld [vmem:[%s1227_s3 + $0x98] sm:$0xff] }
  0x13   :  { %748 = vmatpush3.bf16.msra.mxu1 %v747_v42  ;;  %v268_v19 = vld [vmem:[%s1227_s3 + $0x100] sm:$0xff]  ;;  %v269_v20 = vld [vmem:[%s1227_s3 + $0x108] sm:$0xff]  ;;  %v763_v22 = vpack.c.bf16 %v237_v15, %v236_v14  ;;  %v765_v23 = vpack.c.bf16 %v255_v18, %v254_v17  ;;  %v238_v24 = vld [vmem:[%s1227_s3 + $0x10] sm:$0xff]  ;;  %v77_v14 = vlaneseq }
  0x14   :  { %749 = vmatprep.subr.bf16.mxu1 %v833_v3  ;;  %v26_v21 = vld [vmem:[%s1228_s0] sm:$0xff]  ;;  %v239_v25 = vld [vmem:[%s1227_s3 + $0x18] sm:$0xff]  ;;  %v257_v27 = vld [vmem:[%s1227_s3 + $0xa8] sm:$0xff]  ;;  %v794_v28 = vpack.c.bf16 %v269_v20, %v268_v19 }
  0x15   :  { %724 = vmatpush1.bf16.msra.mxu0 %v723_v47  ;;  %v256_v26 = vld [vmem:[%s1227_s3 + $0xa0] sm:$0xff]  ;;  %v270_v29 = vld [vmem:[%s1227_s3 + $0x110] sm:$0xff]  ;;  %v271_v30 = vld [vmem:[%s1227_s3 + $0x118] sm:$0xff]  ;;  %v767_v31 = vpack.c.bf16 %v239_v25, %v238_v24  ;;  %v78_v15 = vshrl.u32 %v77_v14, 7 }
  0x16   :  { %726 = vmatprep.subr.bf16.mxu0 %v725_v48  ;;  %v769_v32 = vpack.c.bf16 %v257_v27, %v256_v26  ;;  %v240_v33 = vld [vmem:[%s1227_s3 + $0x20] sm:$0xff]  ;;  %v241_v34 = vld [vmem:[%s1227_s3 + $0x28] sm:$0xff]  ;;  %v258_v35 = vld [vmem:[%s1227_s3 + $0xb0] sm:$0xff]  ;;  %v797_v37 = vpack.c.bf16 %v271_v30, %v270_v29 }
  0x17   :  { %751 = vmatpush3.bf16.msra.mxu1 %v750_v51  ;;  %v259_v36 = vld [vmem:[%s1227_s3 + $0xb8] sm:$0xff]  ;;  %v771_v38 = vpack.c.bf16 %v241_v34, %v240_v33  ;;  %v242_v40 = vld [vmem:[%s1227_s3 + $0x30] sm:$0xff]  ;;  %v260_v42 = vld [vmem:[%s1227_s3 + $0xc0] sm:$0xff]  ;;  %v83_v18 = vsub.s32 1, %v78_v15  ;;  %v87_v19 = vsub.s32 2, %v78_v15 }
  0x18   :  { %752 = vmatprep.subr.bf16.mxu1 %v833_v3  ;;  %v773_v39 = vpack.c.bf16 %v259_v36, %v258_v35  ;;  %v243_v41 = vld [vmem:[%s1227_s3 + $0x38] sm:$0xff]  ;;  %v261_v43 = vld [vmem:[%s1227_s3 + $0xc8] sm:$0xff]  ;;  %v244_v46 = vld [vmem:[%s1227_s3 + $0x40] sm:$0xff] }
  0x19   :  { %728 = vmatpush1.bf16.msra.mxu0 %v727_v56  ;;  %v775_v44 = vpack.c.bf16 %v243_v41, %v242_v40  ;;  %v777_v45 = vpack.c.bf16 %v261_v43, %v260_v42  ;;  %v245_v47 = vld [vmem:[%s1227_s3 + $0x48] sm:$0xff]  ;;  %v262_v48 = vld [vmem:[%s1227_s3 + $0xd0] sm:$0xff]  ;;  %v263_v49 = vld [vmem:[%s1227_s3 + $0xd8] sm:$0xff] }
  0x1a   :  { %730 = vmatprep.subr.bf16.mxu0 %v729_v57  ;;  %v779_v50 = vpack.c.bf16 %v245_v47, %v244_v46  ;;  %v781_v51 = vpack.c.bf16 %v263_v49, %v262_v48  ;;  %v246_v52 = vld [vmem:[%s1227_s3 + $0x50] sm:$0xff]  ;;  %v247_v53 = vld [vmem:[%s1227_s3 + $0x58] sm:$0xff]  ;;  %v264_v54 = vld [vmem:[%s1227_s3 + $0xe0] sm:$0xff] }
  0x1b   :  { %754 = vmatpush3.bf16.msra.mxu1 %v753_v60  ;;  %v265_v55 = vld [vmem:[%s1227_s3 + $0xe8] sm:$0xff]  ;;  %v783_v56 = vpack.c.bf16 %v247_v53, %v246_v52  ;;  %v248_v58 = vld [vmem:[%s1227_s3 + $0x60] sm:$0xff]  ;;  %v266_v0 = vld [vmem:[%s1227_s3 + $0xf0] sm:$0xff] }
  0x1c   :  { %755 = vmatprep.subr.bf16.mxu1 %v833_v3  ;;  %v785_v57 = vpack.c.bf16 %v265_v55, %v264_v54  ;;  %v249_v59 = vld [vmem:[%s1227_s3 + $0x68] sm:$0xff]  ;;  %v272_v60 = vld [vmem:[%s1227_s3 + $0x120] sm:$0xff]  ;;  %v250_v5 = vld [vmem:[%s1227_s3 + $0x70] sm:$0xff] }
  0x1d   :  { %732 = vmatpush1.bf16.msra.mxu0 %v731_v1  ;;  %v787_v61 = vpack.c.bf16 %v249_v59, %v248_v58  ;;  %v273_v62 = vld [vmem:[%s1227_s3 + $0x128] sm:$0xff]  ;;  %v267_v1 = vld [vmem:[%s1227_s3 + $0xf8] sm:$0xff]  ;;  %v276_v11 = vld [vmem:[%s1227_s3 + $0x140] sm:$0xff] }
  0x1e   :  { %734 = vmatprep.subr.bf16.mxu0 %v733_v2  ;;  %v800_v63 = vpack.c.bf16 %v273_v62, %v272_v60  ;;  %v789_v2 = vpack.c.bf16 %v267_v1, %v266_v0  ;;  %v251_v6 = vld [vmem:[%s1227_s3 + $0x78] sm:$0xff]  ;;  %v75_v17 = vld [vmem:[%s1229_s2] sm:$0x7]  ;;  %v431_v27 = vld [vmem:[%s1230_s5 + $0x8] sm:$0xff] }
  0x1f   :  { %757 = vmatpush3.bf16.msra.mxu1 %v756_v7  ;;  %v274_v7 = vld [vmem:[%s1227_s3 + $0x130] sm:$0xff]  ;;  %v791_v8 = vpack.c.bf16 %v251_v6, %v250_v5  ;;  %v275_v9 = vld [vmem:[%s1227_s3 + $0x138] sm:$0xff]  ;;  %v430_v26 = vld [vmem:[%s1230_s5] sm:$0xff] }
  0x20   :  { %758 = vmatprep.subr.bf16.mxu1 %v833_v3  ;;  %v803_v10 = vpack.c.bf16 %v275_v9, %v274_v7  ;;  %v809_v33 = vpack.c.bf16 %v431_v27, %v430_v26  ;;  %v432_v36 = vld [vmem:[%s1230_s5 + $0x10] sm:$0xff]  ;;  %v435_v40 = vld [vmem:[%s1230_s5 + $0x28] sm:$0xff]  ;;  %v441_v48 = vld [vmem:[%s1230_s5 + $0x58] sm:$0xff] }
  0x21   :  { %736 = vmatpush1.bf16.msra.mxu0 %v735_v12  ;;  %v277_v12 = vld [vmem:[%s1227_s3 + $0x148] sm:$0xff]  ;;  %v436_v42 = vld [vmem:[%s1230_s5 + $0x30] sm:$0xff]  ;;  %v540_v53 = vld [vmem:[%s1231_s4] ss:$0 sm:$0xff] }
  0x22   :  { %762 = vmatprep.subr.bf16.mxu0 %v761_v13  ;;  %v806_v13 = vpack.c.bf16 %v277_v12, %v276_v11  ;;  %v440_v47 = vld [vmem:[%s1230_s5 + $0x50] sm:$0xff]  ;;  %v542_v58 = vld [vmem:[%s1232_s6] ss:$0 sm:$0xff] }
  0x23   :  { %760 = vmatpush3.bf16.msra.mxu1 %v759_v16  ;;  %v79_v16 = vsub.s32 0, %v78_v15  ;;  %v824_v49 = vpack.c.bf16 %v441_v48, %v440_v47 }
  0x24   :  { %157 = vmatmul.mubr.f32.vlgmr.msra.gmra.mrb[0].mxu0 %v26_v21  ;;  %793 = vmatprep.subr.bf16.mxu1 %v833_v3 }
  0x25   :  { %764 = vmatpush3.bf16.msra.mxu0 %v763_v22  ;;  %v80_v20 = vrot.slane %v75_v17, %v79_v16  ;;  %v88_v22 = vrot.slane %v75_v17, %v87_v19 }
  0x26   :  { %653 = vmatmul.mubr.f32.vlgmr.msra.gmra.mrb[0].mxu1 %v26_v21  ;;  %766 = vmatprep.subr.bf16.mxu0 %v765_v23  ;;  %v84_v21 = vrot.slane %v75_v17, %v83_v18 }
  0x27   :  { %795 = vmatpush3.bf16.msra.mxu1 %v794_v28  ;;  %675 = vmatprep.mubr.msk.f32.mxu1 %vm835_vm0, %v834_v4 }
  0x28   :  { %796 = vmatprep.subr.bf16.mxu1 %v833_v3 }
  0x29   :  { %768 = vmatpush3.bf16.msra.mxu0 %v767_v31 }
  0x2a   :  { %770 = vmatprep.subr.bf16.mxu0 %v769_v32 }
  0x2b   :  { %798 = vmatpush3.bf16.msra.mxu1 %v797_v37  ;;  %v433_v37 = vld [vmem:[%s1230_s5 + $0x18] sm:$0xff] }
  0x2c   :  { %799 = vmatprep.subr.bf16.mxu1 %v833_v3 }
  0x2d   :  { %772 = vmatpush3.bf16.msra.mxu0 %v771_v38  ;;  %v812_v38 = vpack.c.bf16 %v433_v37, %v432_v36 }
  0x2e   :  { %774 = vmatprep.subr.bf16.mxu0 %v773_v39  ;;  %v434_v39 = vld [vmem:[%s1230_s5 + $0x20] sm:$0xff] }
  0x2f   :  { %801 = vmatpush3.bf16.msra.mxu1 %v800_v63  ;;  %v815_v41 = vpack.c.bf16 %v435_v40, %v434_v39 }
  0x30   :  { %802 = vmatprep.subr.bf16.mxu1 %v833_v3 }
  0x31   :  { %776 = vmatpush3.bf16.msra.mxu0 %v775_v44  ;;  %v438_v44 = vld [vmem:[%s1230_s5 + $0x40] sm:$0xff] }
  0x32   :  { %778 = vmatprep.subr.bf16.mxu0 %v777_v45  ;;  %v439_v45 = vld [vmem:[%s1230_s5 + $0x48] sm:$0xff] }
  0x33   :  { %804 = vmatpush3.bf16.msra.mxu1 %v803_v10  ;;  %v821_v46 = vpack.c.bf16 %v439_v45, %v438_v44 }
  0x34   :  { %805 = vmatprep.subr.bf16.mxu1 %v833_v3 }
  0x35   :  { %780 = vmatpush3.bf16.msra.mxu0 %v779_v50 }
  0x36   :  { %782 = vmatprep.subr.bf16.mxu0 %v781_v51 }
  0x37   :  { %807 = vmatpush3.bf16.msra.mxu1 %v806_v13 }
  0x38   :  { %808 = vmatprep.subr.bf16.mxu1 %v833_v3 }
  0x39   :  { %784 = vmatpush3.bf16.msra.mxu0 %v783_v56 }
  0x3a   :  { %786 = vmatprep.subr.bf16.mxu0 %v785_v57 }
  0x3d   :  { %788 = vmatpush3.bf16.msra.mxu0 %v787_v61 }
  0x3e   :  { %790 = vmatprep.subr.bf16.mxu0 %v789_v2 }
  0x41   :  { %792 = vmatpush3.bf16.msra.mxu0 %v791_v8 }
  0xf7   :  { %v158_v23 = vpop.f32.mrb[0].mxu0 }
  0xf8   :  { %v159_v24 = vadd.f32 %v158_v23, %v80_v20  ;;  %v160_v25 = vpop.f32.mrb[1].mxu0 }
  0xf9   :  { %v161_v28 = vadd.f32 %v160_v25, %v84_v21  ;;  %v229_v29 = vpop.f32.mrb[0].mxu1 }
  0xfa   :  { %v230_v30 = vadd.f32 %v229_v29, %v88_v22  ;;  %v654_v31 = vpop.f32.mrb[1].mxu1  ;;  %v233_v34 = vmax.f32 %v159_v24, 0.0 }
  0xfb   :  { %v234_v32 = vmax.f32 %v161_v28, 0.0 }
  0xfc   :  { %v235_v35 = vmax.f32 %v230_v30, 0.0 }
  0xfd   :  { %353 = vmatprep.mubr.f32.mxu0 %v234_v32 }
  0xfe   :  { %354 = vmatmul.mubr.f32.vlgmr.msra.gmra.mrb[2].mxu0 %v233_v34  ;;  %676 = vmatmul.mubr.msk.f32.vlgmr.msra.gmra.mrb[2].mxu1 %vm285_vm1, %v235_v35 }
  0xff   :  { %810 = vmatpush3.bf16.msra.mxu1 %v809_v33  ;;  %702 = vmatprep.mubr.msk.f32.mxu1 %vm835_vm0, %v834_v4  ;;  %v437_v4 = vld [vmem:[%s1230_s5 + $0x38] sm:$0xff] }
 0x100   :  { %811 = vmatprep.subr.bf16.mxu1 %v833_v3  ;;  %v818_v43 = vpack.c.bf16 %v437_v4, %v436_v42 }
 0x103   :  { %813 = vmatpush3.bf16.msra.mxu1 %v812_v38 }
 0x104   :  { %814 = vmatprep.subr.bf16.mxu1 %v833_v3 }
 0x107   :  { %816 = vmatpush3.bf16.msra.mxu1 %v815_v41 }
 0x108   :  { %817 = vmatprep.subr.bf16.mxu1 %v833_v3 }
 0x10b   :  { %819 = vmatpush3.bf16.msra.mxu1 %v818_v43 }
 0x10c   :  { %820 = vmatprep.subr.bf16.mxu1 %v833_v3 }
 0x10f   :  { %822 = vmatpush3.bf16.msra.mxu1 %v821_v46 }
 0x110   :  { %823 = vmatprep.subr.bf16.mxu1 %v833_v3 }
 0x113   :  { %825 = vmatpush3.bf16.msra.mxu1 %v824_v49 }
 0x1d1   :  { %v593_v50 = vpop.f32.mrb[2].mxu0  ;;  %v425_v51 = vpop.f32.mrb[2].mxu1 }
 0x1d2   :  { %v594_v52 = vpop.f32.mrb[3].mxu0  ;;  %v677_v54 = vpop.f32.mrb[3].mxu1 }
 0x1d3   :  { %v595_v55 = vadd.f32 %v594_v52, %v593_v50 }
 0x1d5   :  { %v356_v3 = vadd.f32 %v595_v55, %v540_v53 }
 0x1d7   :  { %v426_v56 = vadd.f32 %v425_v51, %v356_v3 }
 0x1d9   :  { %v429_v57 = vmax.f32 %v426_v56, 0.0 }
 0x1db   :  { %703 = vmatmul.mubr.msk.f32.vlgmr.msra.gmra.mrb[4].mxu1 %vm449_vm2, %v429_v57 }
 0x2ae   :  { %v519_v59 = vpop.f32.mrb[4].mxu1 }
 0x2af   :  { %v520_v60 = vadd.f32 %v542_v58, %v519_v59  ;;  %v704_v61 = vpop.f32.mrb[5].mxu1 }
 0x2b1   :  { %v524_v62 = vsel %vm523_vm3, %v520_v60, -inf }
 0x2b2   :  { %525 = vmax.xlane.f32.xlu0 %v524_v62 }
 0x33f   :  { %v526_v63 = vpop.xlane.xlu0 %525 }
 0x340   :  { %v527_v0 = vsub.f32 %v520_v60, %v526_v63 }
 0x342   :  { %v528_v1 = vmul.f32 1.442695, %v527_v0 }
 0x344   :  { %829 = vpow2.f32 %v528_v1 }
 0x34e   :  { %v830_v2 = vpop.eup %829 }
 0x34f   :  { %v530_v5 = vsel %vm523_vm3, %v830_v2, 0.0 }
 0x350   :  { %531 = vadd.xlane.f32.xlu0 %v530_v5 }
 0x3dd   :  { %v532_v6 = vpop.xlane.xlu0 %531 }
 0x3de   :  { %831 = vrcp.f32 %v532_v6 }
 0x3e8   :  { %v832_v7 = vpop.eup %831 }
 0x3e9   :  { %v534_v8 = vmul.f32 %v832_v7, %v830_v2 }
 0x3eb   :  { %535 = vst.msk [vmem:[%s1233_s7] sm:$0xff] %vm523_vm3, %v534_v8 }

</bundles_post_ra>
